<compile_context>
chip_gen: v5e
topology: v5e:2x2
jax: 0.10.0
libtpu: 0.0.40
codegen_flags: <defaults>
</compile_context>

<pallas_src>
import jax
import jax.numpy as jnp
from jax.experimental import pallas as pl
from jax.experimental.pallas import tpu as pltpu


# --------------------------------------------------------------------------- #
# Kernel
# --------------------------------------------------------------------------- #
def _rope_kernel(rope_ref, q_ref, k_ref, qo_ref, ko_ref):
    rope = rope_ref[...]                          # (1, blk) -> broadcasts over rows
    blk = q_ref.shape[-1]

    # Parity of the flattened position == parity of the local lane index,
    # because every block starts at an even (multiple-of-128) offset.
    # Built once at (1, blk); jnp.where broadcasts it over the G rows.
    lane = jax.lax.broadcasted_iota(jnp.int32, (1, blk), 1)
    even = (lane & 1) == 0

    def apply(x):
        # np.roll semantics: roll(x, s)[p] = x[p - s]  (mod blk)
        nxt = pltpu.roll(x, blk - 1, axis=1)      # nxt[p] = x[p + 1]  (wrap lane masked)
        prv = pltpu.roll(x, 1, axis=1)            # prv[p] = x[p - 1]  (wrap lane masked)
        rot = jnp.where(even, -nxt, prv)          # interleaved pair rotation
        # out = x*rope + rot*(1 - rope)  ==  rot + (x - rot)*rope
        return rot + (x - rot) * rope

    qo_ref[...] = apply(q_ref[...]).astype(qo_ref.dtype)
    ko_ref[...] = apply(k_ref[...]).astype(ko_ref.dtype)


# --------------------------------------------------------------------------- #
# Host-side helpers
# --------------------------------------------------------------------------- #
def _make_rope_table(T, D):
    """Flattened (1, T*D) table: even lanes = cos(angle), odd lanes = sin(angle)."""
    positions = jnp.arange(T, dtype=jnp.float32)                        # (T,)
    inv_freq = 10000.0 ** (jnp.arange(0, D, 2, dtype=jnp.float32) / D)  # (D/2,)
    angles = positions[:, None] / inv_freq                              # (T, D/2)
    rope = jnp.stack([jnp.cos(angles), jnp.sin(angles)], axis=-1)       # (T, D/2, 2)
    return rope.reshape(1, T * D).astype(jnp.float32)


def _tpu_generation_defaults():
    """(target_block_bytes_per_stream, min_total_grid_steps) for the attached TPU."""
    try:
        kind = jax.devices()[0].device_kind.lower()
    except Exception:  # pragma: no cover - defensive
        kind = ""
    if "v7" in kind or "tpu7" in kind:
        # v7x: 64 MiB VMEM / 2 TensorCores -> smaller tiles, >=2 steps per core.
        return 2 << 20, 4
    # v5e / v6e: 128 MiB VMEM, lower HBM BW -> 4 MiB tiles keep the ~0.35 us
    # per-step overhead negligible while staying far from the VMEM limit.
    return 4 << 20, 2


def _choose_tiling(BH, TD, itemsize, *, target_block_bytes, min_total_steps):
    """Pick (rows per block G, lanes per block TD_blk).

    Blocks satisfy the (8,128) constraint: G is a multiple of 8 or == BH,
    TD_blk is a multiple of 128 or == TD.  Column tiling (instead of shrinking
    rows to 8) keeps the per-stream tile within budget for any T.
    """
    # Tiny problem: one whole-array block (block == full dims is always legal).
    if BH * TD * itemsize <= target_block_bytes:
        return BH, TD

    # Legal column blocks: multiples of 128 dividing TD (else only the full TD).
    if TD % 128 == 0:
        col_divs = [d for d in range(128, TD + 1, 128) if TD % d == 0]
    else:
        col_divs = [TD]
    # Legal row blocks: multiples of 8 dividing BH (else only the full BH).
    if BH % 8 == 0:
        row_divs = [g for g in range(8, BH + 1, 8) if BH % g == 0]
    else:
        row_divs = [BH]

    # Column block: even the minimal 8-row tile must fit the budget, so the
    # fallback can never exceed VMEM for long sequences.
    fitting_cols = [d for d in col_divs if 8 * d * itemsize <= target_block_bytes]
    td_blk = max(fitting_cols) if fitting_cols else min(col_divs)
    # Row block: largest that keeps the per-stream tile within budget.
    fitting_rows = [g for g in row_divs if g * td_blk * itemsize <= target_block_bytes]
    g_rows = max(fitting_rows) if fitting_rows else min(row_divs)

    def n_steps(g, c):
        return (BH // g) * (TD // c)

    # Prefer enough grid steps for pipelining and for both v7x TensorCores.
    while n_steps(g_rows, td_blk) < min_total_steps:
        smaller_rows = [g for g in row_divs if g < g_rows]
        smaller_cols = [c for c in col_divs if c < td_blk]
        if smaller_rows:
            g_rows = max(smaller_rows)
        elif smaller_cols:
            td_blk = max(smaller_cols)
        else:
            break
    return g_rows, td_blk


# --------------------------------------------------------------------------- #
# Public wrapper
# --------------------------------------------------------------------------- #
def rope_pallas(q, k, *, donate_inputs=False):
    """q, k: (B, H, T, D) float32  ->  (q_rotated, k_rotated), same shape."""
    B, H, T, D = q.shape
    assert D % 2 == 0, "RoPE head dim must be even"
    BH, TD = B * H, T * D
    itemsize = q.dtype.itemsize

    # Lane-dense flattening (contiguous -> free reshapes).
    q2 = q.reshape(BH, TD)
    k2 = k.reshape(BH, TD)
    rope = _make_rope_table(T, D)                           # (1, TD) float32

    target_bytes, min_steps = _tpu_generation_defaults()
    G, TD_blk = _choose_tiling(BH, TD, itemsize,
                               target_block_bytes=target_bytes,
                               min_total_steps=min_steps)
    grid = (BH // G, TD // TD_blk)

    row_spec = pl.BlockSpec((G, TD_blk), lambda i, j: (i, j))
    rope_spec = pl.BlockSpec((1, TD_blk), lambda i, j: (0, j))

    # Size the VMEM limit from the actual allocation:
    #   4 data streams (q/k in + out) x 2 buffers x tile
    #   + 2 buffers x sublane-padded (8, TD_blk) rope block, plus headroom.
    tile_bytes = G * TD_blk * itemsize
    rope_bytes = 8 * TD_blk * rope.dtype.itemsize
    vmem_bytes = 4 * 2 * tile_bytes + 2 * rope_bytes
    vmem_limit = min(int(vmem_bytes * 1.25) + (2 << 20), 56 << 20)

    extra = {}
    if donate_inputs:
        # Operands: 0=rope, 1=q2, 2=k2 ; outputs: 0=q_out, 1=k_out.
        extra["input_output_aliases"] = {1: 0, 2: 1}

    qo, ko = pl.pallas_call(
        _rope_kernel,
        out_shape=(
            jax.ShapeDtypeStruct((BH, TD), q.dtype),
            jax.ShapeDtypeStruct((BH, TD), k.dtype),
        ),
        grid_spec=pltpu.PrefetchScalarGridSpec(
            num_scalar_prefetch=0,
            grid=grid,
            in_specs=[rope_spec, row_spec, row_spec],
            out_specs=[row_spec, row_spec],
        ),
        compiler_params=pltpu.CompilerParams(
            dimension_semantics=("parallel", "parallel"),
            vmem_limit_bytes=vmem_limit,
        ),
        **extra,
    )(rope, q2, k2)

    return qo.reshape(B, H, T, D), ko.reshape(B, H, T, D)


# --------------------------------------------------------------------------- #
# Pure-JAX reference (replica of the PyTorch forward)
# --------------------------------------------------------------------------- #
def _rope_reference(q, k):
    B, H, T, D = q.shape
    rope = _make_rope_table(T, D).reshape(T, D)
    rope = jnp.broadcast_to(rope, q.shape)

    def rotate(x):
        x_even = x[..., 0::2]
        x_odd = x[..., 1::2]
        return jnp.stack([-x_odd, x_even], axis=-1).reshape(x.shape)

    q_out = q * rope + rotate(q) * (1.0 - rope)
    k_out = k * rope + rotate(k) * (1.0 - rope)
    return q_out, k_out


if __name__ == "__main__":
    B, H, T, D = 2, 4, 8, 32
    key = jax.random.PRNGKey(0)
    kq, kk = jax.random.split(key)
    q = jax.random.normal(kq, (B, H, T, D), dtype=jnp.float32)
    k = jax.random.normal(kk, (B, H, T, D), dtype=jnp.float32)

    q_out, k_out = rope_pallas(q, k)
    jax.block_until_ready((q_out, k_out))

    q_ref, k_ref = _rope_reference(q, k)
    assert jnp.allclose(q_out, q_ref, atol=1e-5, rtol=1e-5), "q mismatch"
    assert jnp.allclose(k_out, k_ref, atol=1e-5, rtol=1e-5), "k mismatch"

    print("KERNEL_OK")
</pallas_src>

<mosaic_0001>
module attributes {stable_mosaic.version = 11 : i64} {
  func.func @_rope_kernel(%arg0: i32, %arg1: i32, %arg2: memref<1x256xf32, #tpu.memory_space<vmem>>, %arg3: memref<8x256xf32, #tpu.memory_space<vmem>>, %arg4: memref<8x256xf32, #tpu.memory_space<vmem>>, %arg5: memref<8x256xf32, #tpu.memory_space<vmem>>, %arg6: memref<8x256xf32, #tpu.memory_space<vmem>>) attributes {dimension_semantics = [#tpu.dimension_semantics<parallel>, #tpu.dimension_semantics<parallel>], iteration_bounds = array<i64: 1, 1>, scalar_prefetch = 0 : i64, scratch_operands = 0 : i64, tpu.core_type = #tpu.core_type<tc>, window_params = [{transform_indices = @transform_0, window_bounds = array<i64: 1, 256>}, {transform_indices = @transform_1, window_bounds = array<i64: 8, 256>}, {transform_indices = @transform_2, window_bounds = array<i64: 8, 256>}, {transform_indices = @transform_3, window_bounds = array<i64: 8, 256>}, {transform_indices = @transform_4, window_bounds = array<i64: 8, 256>}]} {
    %c0 = arith.constant 0 : index
    %c0_0 = arith.constant 0 : index
    %0 = vector.load %arg2[%c0, %c0_0] : memref<1x256xf32, #tpu.memory_space<vmem>>, vector<1x256xf32>
    %1 = tpu.iota {dimensions = array<i32: 1>} : vector<1x256xi32>
    %c1_i32 = arith.constant 1 : i32
    %2 = vector.broadcast %c1_i32 : i32 to vector<1x256xi32>
    %3 = arith.andi %1, %2 : vector<1x256xi32>
    %c0_i32 = arith.constant 0 : i32
    %4 = vector.broadcast %c0_i32 : i32 to vector<1x256xi32>
    %5 = arith.cmpi eq, %3, %4 : vector<1x256xi32>
    %c0_1 = arith.constant 0 : index
    %c0_2 = arith.constant 0 : index
    %6 = vector.load %arg3[%c0_1, %c0_2] : memref<8x256xf32, #tpu.memory_space<vmem>>, vector<8x256xf32>
    %c255_i32 = arith.constant 255 : i32
    %7 = tpu.dynamic_rotate %6 by %c255_i32 dim 1 : vector<8x256xf32>, i32 -> vector<8x256xf32>
    %c1_i32_3 = arith.constant 1 : i32
    %8 = tpu.dynamic_rotate %6 by %c1_i32_3 dim 1 : vector<8x256xf32>, i32 -> vector<8x256xf32>
    %cst = arith.constant 0.000000e+00 : f32
    %9 = vector.broadcast %cst : f32 to vector<8x256xf32>
    %10 = arith.subf %9, %7 : vector<8x256xf32>
    %11 = vector.shape_cast %5 : vector<1x256xi1> to vector<1x256xi1>
    %12 = vector.broadcast %11 : vector<1x256xi1> to vector<8x256xi1>
    %13 = arith.select %12, %10, %8 : vector<8x256xi1>, vector<8x256xf32>
    %14 = arith.subf %6, %13 : vector<8x256xf32>
    %15 = vector.broadcast %0 : vector<1x256xf32> to vector<8x256xf32>
    %16 = arith.mulf %14, %15 : vector<8x256xf32>
    %17 = arith.addf %13, %16 : vector<8x256xf32>
    %c0_4 = arith.constant 0 : index
    %c0_5 = arith.constant 0 : index
    %18 = vector.load %arg5[%c0_4, %c0_5] : memref<8x256xf32, #tpu.memory_space<vmem>>, vector<8x256xf32>
    tpu.vector_store %arg5[%c0_4, %c0_5], %17 {strides = array<i32>} : memref<8x256xf32, #tpu.memory_space<vmem>>, vector<8x256xf32>,
    %c0_6 = arith.constant 0 : index
    %c0_7 = arith.constant 0 : index
    %19 = vector.load %arg4[%c0_6, %c0_7] : memref<8x256xf32, #tpu.memory_space<vmem>>, vector<8x256xf32>
    %c255_i32_8 = arith.constant 255 : i32
    %20 = tpu.dynamic_rotate %19 by %c255_i32_8 dim 1 : vector<8x256xf32>, i32 -> vector<8x256xf32>
    %c1_i32_9 = arith.constant 1 : i32
    %21 = tpu.dynamic_rotate %19 by %c1_i32_9 dim 1 : vector<8x256xf32>, i32 -> vector<8x256xf32>
    %cst_10 = arith.constant 0.000000e+00 : f32
    %22 = vector.broadcast %cst_10 : f32 to vector<8x256xf32>
    %23 = arith.subf %22, %20 : vector<8x256xf32>
    %24 = vector.shape_cast %5 : vector<1x256xi1> to vector<1x256xi1>
    %25 = vector.broadcast %24 : vector<1x256xi1> to vector<8x256xi1>
    %26 = arith.select %25, %23, %21 : vector<8x256xi1>, vector<8x256xf32>
    %27 = arith.subf %19, %26 : vector<8x256xf32>
    %28 = vector.broadcast %0 : vector<1x256xf32> to vector<8x256xf32>
    %29 = arith.mulf %27, %28 : vector<8x256xf32>
    %30 = arith.addf %26, %29 : vector<8x256xf32>
    %c0_11 = arith.constant 0 : index
    %c0_12 = arith.constant 0 : index
    %31 = vector.load %arg6[%c0_11, %c0_12] : memref<8x256xf32, #tpu.memory_space<vmem>>, vector<8x256xf32>
    tpu.vector_store %arg6[%c0_11, %c0_12], %30 {strides = array<i32>} : memref<8x256xf32, #tpu.memory_space<vmem>>, vector<8x256xf32>,
    return
  }
  func.func @transform_0(%arg0: i32, %arg1: i32) -> (i32, i32) {
    %c0_i32 = arith.constant 0 : i32
    %c0_i32_0 = arith.constant 0 : i32
    return %c0_i32, %arg1 : i32, i32
  }
  func.func @transform_1(%arg0: i32, %arg1: i32) -> (i32, i32) {
    %c0_i32 = arith.constant 0 : i32
    return %arg0, %arg1 : i32, i32
  }
  func.func @transform_2(%arg0: i32, %arg1: i32) -> (i32, i32) {
    %c0_i32 = arith.constant 0 : i32
    return %arg0, %arg1 : i32, i32
  }
  func.func @transform_3(%arg0: i32, %arg1: i32) -> (i32, i32) {
    %c0_i32 = arith.constant 0 : i32
    return %arg0, %arg1 : i32, i32
  }
  func.func @transform_4(%arg0: i32, %arg1: i32) -> (i32, i32) {
    %c0_i32 = arith.constant 0 : i32
    return %arg0, %arg1 : i32, i32
  }
}

</mosaic_0001>

<bundles_post_ra>
// kernel: tpu_custom_call.1
= control target key start
LH: loop header
LB: loop body
LE: loop exit
PB: predicated region body
PF: predicated region fallthrough
CT: control target
= control target key end

     0   :  { %10 = vsyncpa [#allocation3], 0  ;;  %s380_s0 = inlined_call_operand.hbm [shape: f32[1,256], index: 0, kind: input, shape index: {}]   ;;  %s381_s1 = inlined_call_operand.hbm [shape: f32[8,256], index: 1, kind: input, shape index: {}]   ;;  %s382_s2 = inlined_call_operand.hbm [shape: f32[8,256], index: 2, kind: input, shape index: {}]   ;;  %s383_s3 = inlined_call_operand.hbm [shape: f32[8,256], index: 3, kind: output, shape index: {0}]   ;;  %s384_s4 = inlined_call_operand.hbm [shape: f32[8,256], index: 4, kind: output, shape index: {1}]  }
   0x1   :  { %11 = vsyncpa [#allocation6], 0 }
   0x2   :  { %12 = vsyncpa [#allocation4], 0  ;;  %s30_s17 = sshll.u32 %s381_s1, 4  ;;  %s31_s17 = int_to_ptr.hbm [resolvable:$true] %s30_s17 }
   0x3   :  { %13 = vsyncpa [#allocation10], 0  ;;  %s299_s18 = smov [#allocation5]   ;;  %s19_s22 = sshll.u32 %s380_s0, 4  ;;  %s20_s22 = int_to_ptr.hbm [resolvable:$true] %s19_s22 }
   0x4   :  { %s32_s19 = sshll.u32 %s299_s18, 4  ;;  %s300_s23 = smov [#allocation2]   ;;  %s33_s19 = int_to_ptr.vmem [resolvable:$true] %s32_s19 }
   0x5   :  { %35 = dma.hbm_to_vmem [thread:$0]  %s31_s17, 256, %s33_s19, [#allocation6]  }
   0x6   :  { %s21_s24 = sshll.u32 %s300_s23, 4  ;;  %s41_s27 = sshll.u32 %s382_s2, 4  ;;  %s22_s24 = int_to_ptr.vmem [resolvable:$true] %s21_s24  ;;  %s42_s27 = int_to_ptr.hbm [resolvable:$true] %s41_s27 }
   0x7   :  { %24 = dma.hbm_to_vmem [thread:$0]  %s20_s22, 32, %s22_s24, [#allocation3]  }
   0x8   :  { %s301_s1 = smov [#allocation7]  }
   0x9   :  { %s43_s28 = sshll.u32 %s301_s1, 4  ;;  %s44_s28 = int_to_ptr.vmem [resolvable:$true] %s43_s28 }
   0xa   :  { %46 = dma.hbm_to_vmem [thread:$0]  %s42_s27, 256, %s44_s28, [#allocation6]  }
   0xb   :  { %291 = dma.done.wait [#allocation3], 32  }
   0xc   :  { %292 = vsyncadd [#allocation3], 4294967264 }
   0xd   :  { %293 = dma.done.wait [#allocation6], 512  }
   0xe   :  { %294 = vsyncadd [#allocation6], 4294966784  ;;  %v340_v0 = vld [vmem:[#allocation7] sm:$0xff]  ;;  %v67_v1 = vld [vmem:[#allocation5] sm:$0xff]  ;;  %s302_s0 = smov 127   ;;  %s303_s29 = smov 1   ;;  %v60_v4 = vlaneseq }
   0xf   :  { %106 = vrot.lane.b32.xlu1 %v340_v0, %s302_s0  ;;  %69 = vrot.lane.b32.xlu0 %v67_v1, %s302_s0  ;;  %v343_v2 = vld [vmem:[#allocation7 + $0x8] sm:$0xff]  ;;  %v68_v3 = vld [vmem:[#allocation5 + $0x8] sm:$0xff]  ;;  %s304_s2 = smov [#allocation8]   ;;  %s137_s7 = sshll.u32 %s383_s3, 4  ;;  %s138_s7 = int_to_ptr.hbm [resolvable:$true] %s137_s7 }
  0x10   :  { %76 = vrot.lane.b32.xlu2 %v67_v1, %s303_s29  ;;  %v61_v6 = vand.u32 127, %v60_v4  ;;  %v59_v15 = vld [vmem:[#allocation2] sm:$0x3]  ;;  %s135_s30 = sshll.u32 %s304_s2, 4  ;;  %s305_s3 = smov [#allocation9]   ;;  %s136_s30 = int_to_ptr.vmem [resolvable:$true] %s135_s30 }
  0x11   :  { %v94_v24 = vperm.slane %v59_v15, 0  ;;  %v95_v25 = vperm.slane %v59_v15, 1  ;;  %s146_s8 = sshll.u32 %s305_s3, 4  ;;  %s148_s11 = sshll.u32 %s384_s4, 4  ;;  %s147_s8 = int_to_ptr.vmem [resolvable:$true] %s146_s8  ;;  %s149_s11 = int_to_ptr.hbm [resolvable:$true] %s148_s11 }
  0x12   :  { %v62_v9 = vadd.s32 128, %v61_v6  ;;  %v63_v10 = vand.u32 1, %v61_v6  ;;  %vm73_vm0 = vcmp.lt.s32.totalorder %v61_v6, 127  ;;  %vm80_vm1 = vcmp.lt.s32.totalorder %v61_v6, 1 }
  0x14   :  { %v64_v11 = vand.u32 1, %v62_v9  ;;  %vm350_vm2 = vcmp.eq.s32.totalorder %v63_v10, 0 }
  0x16   :  { %vm354_vm3 = vcmp.eq.s32.totalorder %v64_v11, 0 }
  0x17   :  { %108 = vrot.lane.b32.xlu1 %v343_v2, %s302_s0  ;;  %71 = vrot.lane.b32.xlu0 %v68_v3, %s302_s0 }
  0x18   :  { %78 = vrot.lane.b32.xlu2 %v68_v3, %s303_s29 }
  0x1f   :  { %114 = vrot.lane.b32.xlu1 %v343_v2, %s303_s29  ;;  %112 = vrot.lane.b32.xlu0 %v340_v0, %s303_s29 }
  0x6a   :  { %v77_v5 = vpop.permute.xlu2 %76 }
  0x72   :  { %v79_v12 = vpop.permute.xlu2 %78 }
  0x73   :  { %v81_v22 = vsel %vm80_vm1, %v77_v5, %v79_v12  ;;  %v82_v23 = vsel %vm80_vm1, %v79_v12, %v77_v5 }
  0x81   :  { %v107_v7 = vpop.permute.xlu1 %106  ;;  %v70_v8 = vpop.permute.xlu0 %69 }
  0x89   :  { %v109_v13 = vpop.permute.xlu1 %108  ;;  %v72_v14 = vpop.permute.xlu0 %71 }
  0x8a   :  { %v74_v16 = vsel %vm73_vm0, %v70_v8, %v72_v14  ;;  %v75_v17 = vsel %vm73_vm0, %v72_v14, %v70_v8  ;;  %v110_v28 = vsel %vm73_vm0, %v107_v7, %v109_v13  ;;  %v111_v29 = vsel %vm73_vm0, %v109_v13, %v107_v7 }
  0x8b   :  { %v83_v20 = vsub.f32 0.0, %v74_v16  ;;  %v84_v21 = vsub.f32 0.0, %v75_v17  ;;  %v118_v34 = vsub.f32 0.0, %v110_v28  ;;  %v119_v35 = vsub.f32 0.0, %v111_v29 }
  0x8d   :  { %v89_v26 = vsel %vm350_vm2, %v83_v20, %v82_v23  ;;  %v90_v27 = vsel %vm354_vm3, %v84_v21, %v81_v22 }
  0x8e   :  { %v91_v30 = vsub.f32 %v67_v1, %v89_v26  ;;  %v92_v31 = vsub.f32 %v68_v3, %v90_v27 }
  0x90   :  { %v98_v32 = vmul.f32 %v94_v24, %v91_v30  ;;  %v99_v33 = vmul.f32 %v95_v25, %v92_v31 }
  0x91   :  { %v115_v36 = vpop.permute.xlu1 %114  ;;  %v113_v37 = vpop.permute.xlu0 %112 }
  0x92   :  { %v116_v38 = vsel %vm80_vm1, %v113_v37, %v115_v36  ;;  %v117_v39 = vsel %vm80_vm1, %v115_v36, %v113_v37  ;;  %v100_v40 = vadd.f32 %v98_v32, %v89_v26  ;;  %v101_v41 = vadd.f32 %v99_v33, %v90_v27 }
  0x93   :  { %v120_v42 = vsel %vm350_vm2, %v118_v34, %v117_v39  ;;  %v121_v43 = vsel %vm354_vm3, %v119_v35, %v116_v38 }
  0x94   :  { %v122_v44 = vsub.f32 %v340_v0, %v120_v42  ;;  %v123_v45 = vsub.f32 %v343_v2, %v121_v43  ;;  %102 = vst [vmem:[#allocation8] sm:$0xff] %v100_v40 }
  0x95   :  { %103 = vst [vmem:[#allocation8 + $0x8] sm:$0xff] %v101_v41 }
  0x96   :  { %v124_v46 = vmul.f32 %v122_v44, %v94_v24  ;;  %v125_v47 = vmul.f32 %v123_v45, %v95_v25  ;;  %140 = dma.vmem_to_hbm [thread:$0]  %s136_s30, 256, %s138_s7, [#allocation4]  }
  0x98   :  { %v126_v48 = vadd.f32 %v124_v46, %v120_v42  ;;  %v127_v49 = vadd.f32 %v125_v47, %v121_v43 }
  0x9a   :  { %128 = vst [vmem:[#allocation9] sm:$0xff] %v126_v48 }
  0x9b   :  { %129 = vst [vmem:[#allocation9 + $0x8] sm:$0xff] %v127_v49 }
  0x9c   :  { %151 = dma.vmem_to_hbm [thread:$0]  %s147_s8, 256, %s149_s11, [#allocation10]  }
  0x9d   :  { %295 = dma.done.wait [#allocation4], 256  }
  0x9e   :  { %296 = vsyncadd [#allocation4], 4294967040 }
  0x9f   :  { %297 = dma.done.wait [#allocation10], 256  }
  0xa0   :  { %298 = vsyncadd [#allocation10], 4294967040 }
  0xa1   :  { %160 = vsyncpa [#allocation3], 1 }
  0xa2   :  { %161 = vsyncpa [#allocation6], 1 }
  0xa3   :  { %162 = vsyncpa [#allocation4], 1 }
  0xa4   :  { %163 = vsyncpa [#allocation10], 1 }

</bundles_post_ra>
